<compile_context>
chip_gen: v7x
topology: tpu7x:2x2x1
jax: 0.10.0
libtpu: 0.0.40
codegen_flags: <defaults>
</compile_context>

<pallas_src>
import functools

import jax
import jax.numpy as jnp
from jax.experimental import pallas as pl
from jax.experimental.pallas import tpu as pltpu


def _self_attention_kernel(x_ref, wqkv_ref, wo_ref, bias_ref, o_ref, attn_ref, *,
                           block_batch, seq, heads, dim_head, scale):
    """One grid step = `block_batch` batch elements, all heads fused.

    x_ref    : (BB*N, C)          flattened block of batch elements
    wqkv_ref : (C, 3*H*Dh)        fused Q/K/V projection weight (grid-constant)
    wo_ref   : (H*Dh, C)          output projection weight (grid-constant)
    bias_ref : (1, C)             output projection bias (grid-constant)
    o_ref    : (BB*N, C)          output block
    attn_ref : (BB*N, H*Dh) f32   VMEM slab collecting per-head outputs
    """
    rows = block_batch * seq
    hd = heads * dim_head

    x = x_ref[...]                                    # (rows, C), input dtype
    in_dtype = x.dtype
    # NOTE: for bf16 activations/weights the MXU operands stay bf16 below while
    # accumulation remains f32 (preferred_element_type) -- 4-8x MXU throughput
    # once steps become compute-bound.

    # Single fused QKV projection over the whole batch block (M = BB*N rows).
    qkv = jnp.dot(x, wqkv_ref[...],
                  preferred_element_type=jnp.float32)  # (rows, 3*H*Dh) f32

    # Softmax scale folded into q (rows*Dh elements instead of rows*N).
    q = (qkv[:, 0 * hd:1 * hd] * scale).astype(in_dtype)   # (rows, H*Dh)
    k = qkv[:, 1 * hd:2 * hd].astype(in_dtype)
    v = qkv[:, 2 * hd:3 * hd].astype(in_dtype)

    # Per-head attention.  Batch elements inside the block go through one
    # batched (3-D) dot_general per head; head outputs are written directly
    # into the lane-dense attn_ref slab (no lane concatenate, per-head
    # temporaries die at the end of each iteration).  H is tiny and static.
    for h in range(heads):
        lo = h * dim_head
        qh = q[:, lo:lo + dim_head].reshape(block_batch, seq, dim_head)
        kh = k[:, lo:lo + dim_head].reshape(block_batch, seq, dim_head)
        vh = v[:, lo:lo + dim_head].reshape(block_batch, seq, dim_head)

        # s[b, i, j] = sum_d q[b, i, d] * k[b, j, d]  -- no explicit transpose.
        s = jnp.einsum("bqd,bkd->bqk", qh, kh,
                       preferred_element_type=jnp.float32)       # (BB, N, N) f32

        # Numerically-stable softmax in f32; exact division (approx reciprocal
        # removed per review -- N is tiny, the divide is not on a hot unit).
        s_max = jnp.max(s, axis=-1, keepdims=True)
        p = jnp.exp(s - s_max)
        p = p / jnp.sum(p, axis=-1, keepdims=True)

        oh = jnp.einsum("bqk,bkd->bqd", p.astype(in_dtype), vh,
                        preferred_element_type=jnp.float32)      # (BB, N, Dh) f32
        attn_ref[:, lo:lo + dim_head] = oh.reshape(rows, dim_head)

    # Single lane-dense, 128-deep output projection + bias.
    out = jnp.dot(attn_ref[...].astype(in_dtype), wo_ref[...],
                  preferred_element_type=jnp.float32)            # (rows, C) f32
    out = out + bias_ref[...].astype(jnp.float32)
    o_ref[...] = out.astype(o_ref.dtype)

    # TODO(synk): dropout (self.drop_out) is a no-op for p=0.0; p>0 would need
    # pltpu.prng_seed / pltpu.prng_random_bits inside the kernel.


def _choose_block_batch(batch, seq, target_rows=256):
    """Largest divisor BB of `batch` with BB*seq <= target_rows, while keeping
    the grid length >= 2 so both v7x TensorCores get work (no-op on v5e/v6e)."""
    best = 1
    for bb in range(1, batch + 1):
        if batch % bb:
            continue
        if bb * seq > max(target_rows, seq):
            continue
        if batch >= 2 and batch // bb < 2:
            continue
        best = bb
    return best


def prepare_self_attention_weights(wq, wk, wv, bias):
    """One-time weight prep (hoisted out of the per-call path).

    wq/wk/wv: (C, H*Dh) -- nn.Linear weights stored transposed (in, out).
    Returns (wqkv, bias2d) with wqkv: (C, 3*H*Dh), bias2d: (1, C).
    """
    wqkv = jnp.concatenate([wq, wk, wv], axis=1)
    return wqkv, bias.reshape(1, -1)


def self_attention(x, wqkv, wo, bias2d, *, heads, dim_head, block_batch=None):
    """x: (B, N, C); wqkv: (C, 3*H*Dh); wo: (H*Dh, C) [to_out weight transposed];
    bias2d: (1, C)."""
    B, N, C = x.shape
    hd = heads * dim_head
    scale = float(dim_head) ** -0.5

    bb = _choose_block_batch(B, N) if block_batch is None else block_batch
    assert B % bb == 0, "block_batch must divide the batch size"
    rows = bb * N
    grid = (B // bb,)

    # Flatten (B, N, C) -> (B*N, C) in the wrapper (free for a contiguous
    # row-major array) so the kernel sees plain 2-D row blocks.
    x2 = x.reshape(B * N, C)

    kernel = functools.partial(_self_attention_kernel, block_batch=bb, seq=N,
                               heads=heads, dim_head=dim_head, scale=scale)

    grid_spec = pltpu.PrefetchScalarGridSpec(
        num_scalar_prefetch=0,
        grid=grid,
        in_specs=[
            # NOTE: x / out blocks end in C=32 (<128 lanes) -> masked partial
            # loads/stores.  Cheap at this size; inside a larger model, fuse
            # with producers/consumers or carry a lane-dense activation slab
            # instead of round-tripping a 32-lane tensor through HBM per call.
            # If a bundle dump shows exposed DMA, add pipeline_mode=
            # pl.Buffered(3) to this x spec only (weights are grid-constant).
            pl.BlockSpec((rows, C), lambda i: (i, 0)),        # x block
            pl.BlockSpec((C, 3 * hd), lambda i: (0, 0)),      # wqkv (resident)
            pl.BlockSpec((hd, C), lambda i: (0, 0)),          # wo   (resident)
            pl.BlockSpec((1, C), lambda i: (0, 0)),           # bias (resident)
        ],
        out_specs=pl.BlockSpec((rows, C), lambda i: (i, 0)),
        scratch_shapes=[pltpu.VMEM((rows, hd), jnp.float32)],  # attn slab
    )

    out2 = pl.pallas_call(
        kernel,
        out_shape=jax.ShapeDtypeStruct((B * N, C), x.dtype),
        grid_spec=grid_spec,
        compiler_params=pltpu.CompilerParams(
            # Batch-block axis is "parallel": shards across both TensorCores
            # on v7x, no-op on v5e/v6e (single TC, serial grid loop).
            dimension_semantics=("parallel",),
            # Working set here is tiny; explicit limit documents headroom.
            # Before N grows toward ~2K, switch to flash-style kv tiling
            # (extra "arbitrary" kv axis + online softmax): the BB*H*N^2 f32
            # score buffers hit v7x's 64 MiB VMEM long before v5e/v6e's 128.
            vmem_limit_bytes=32 * 1024 * 1024,
        ),
    )(x2, wqkv, wo, bias2d)

    return out2.reshape(B, N, C)


def self_attention_reference(x, wq, wk, wv, wo, bias, *, heads, dim_head):
    """Plain-JAX reference mirroring the PyTorch forward."""
    B, N, C = x.shape
    H, Dh = heads, dim_head
    q = (x @ wq).reshape(B, N, H, Dh).transpose(0, 2, 1, 3)
    k = (x @ wk).reshape(B, N, H, Dh).transpose(0, 2, 1, 3)
    v = (x @ wv).reshape(B, N, H, Dh).transpose(0, 2, 1, 3)
    s = jnp.einsum("bhqd,bhkd->bhqk", q, k) * (Dh ** -0.5)
    p = jax.nn.softmax(s, axis=-1)
    o = jnp.einsum("bhqk,bhkd->bhqd", p, v)
    o = o.transpose(0, 2, 1, 3).reshape(B, N, H * Dh)
    return o @ wo + bias


if __name__ == "__main__":
    # Small shapes consistent with the module: dim=32, heads=2, dim_head=64.
    # B=8 exercises batch-blocking: BB=4 -> grid=(2,), 64-row MXU matmuls.
    B, N, DIM = 8, 16, 32
    HEADS, DIM_HEAD = 2, 64
    INNER = HEADS * DIM_HEAD

    key = jax.random.PRNGKey(0)
    kx, kq, kk, kv, ko, kb = jax.random.split(key, 6)

    x = jax.random.normal(kx, (B, N, DIM), dtype=jnp.float32)

    # nn.Linear(dim, inner_dim, bias=False) weights, stored transposed (in, out).
    wq = jax.random.normal(kq, (DIM, INNER), dtype=jnp.float32) * (DIM ** -0.5)
    wk = jax.random.normal(kk, (DIM, INNER), dtype=jnp.float32) * (DIM ** -0.5)
    wv = jax.random.normal(kv, (DIM, INNER), dtype=jnp.float32) * (DIM ** -0.5)
    # The module inits to_out weight/bias to zero; RANDOM values are used here
    # so the assertion actually exercises the QKV/softmax/attention math.
    wo = jax.random.normal(ko, (INNER, DIM), dtype=jnp.float32) * (INNER ** -0.5)
    bo = jax.random.normal(kb, (DIM,), dtype=jnp.float32)

    wqkv, bias2d = prepare_self_attention_weights(wq, wk, wv, bo)

    out = self_attention(x, wqkv, wo, bias2d, heads=HEADS, dim_head=DIM_HEAD)
    out = jax.block_until_ready(out)

    ref = self_attention_reference(x, wq, wk, wv, wo, bo,
                                   heads=HEADS, dim_head=DIM_HEAD)
    assert out.shape == (B, N, DIM)
    # Exact softmax division; remaining slack only covers MXU f32
    # accumulation-order / multi-pass differences vs. the XLA einsum reference.
    assert jnp.allclose(out, ref, atol=1e-3, rtol=1e-3), (
        float(jnp.max(jnp.abs(out - ref))))

    print("KERNEL_OK")
</pallas_src>

<mosaic_0001>
module attributes {stable_mosaic.version = 11 : i64} {
  func.func @_self_attention_kernel(%arg0: i32, %arg1: memref<64x32xf32, #tpu.memory_space<vmem>>, %arg2: memref<32x384xf32, #tpu.memory_space<vmem>>, %arg3: memref<128x32xf32, #tpu.memory_space<vmem>>, %arg4: memref<1x32xf32, #tpu.memory_space<vmem>>, %arg5: memref<64x32xf32, #tpu.memory_space<vmem>>, %arg6: memref<64x128xf32, #tpu.memory_space<vmem>>) attributes {dimension_semantics = [#tpu.dimension_semantics<parallel>], iteration_bounds = array<i64: 2>, scalar_prefetch = 0 : i64, scratch_operands = 1 : i64, tpu.core_type = #tpu.core_type<tc>, window_params = [{transform_indices = @transform_0, window_bounds = array<i64: 64, 32>}, {pipeline_mode = #tpu.pipeline_mode<synchronous>, transform_indices = @transform_1, window_bounds = array<i64: 32, 384>}, {pipeline_mode = #tpu.pipeline_mode<synchronous>, transform_indices = @transform_2, window_bounds = array<i64: 128, 32>}, {pipeline_mode = #tpu.pipeline_mode<synchronous>, transform_indices = @transform_3, window_bounds = array<i64: 1, 32>}, {transform_indices = @transform_4, window_bounds = array<i64: 64, 32>}]} {
    %c0 = arith.constant 0 : index
    %c0_0 = arith.constant 0 : index
    %0 = vector.load %arg1[%c0, %c0_0] : memref<64x32xf32, #tpu.memory_space<vmem>>, vector<64x32xf32>
    %c0_1 = arith.constant 0 : index
    %c0_2 = arith.constant 0 : index
    %1 = vector.load %arg2[%c0_1, %c0_2] : memref<32x384xf32, #tpu.memory_space<vmem>>, vector<32x384xf32>
    %cst = arith.constant dense<0.000000e+00> : vector<64x384xf32>
    %2 = tpu.matmul %0, %1, %cst {dimension_numbers = #tpu.dot_dimension_numbers<[1], [0], [0], [1], [0, 0, 1, 1], [], []>} : vector<64x32xf32>, vector<32x384xf32>, vector<64x384xf32> -> vector<64x384xf32>
    %3 = vector.extract_strided_slice %2 {offsets = [0, 0], sizes = [64, 128], strides = [1, 1]} : vector<64x384xf32> to vector<64x128xf32>
    %cst_3 = arith.constant 1.250000e-01 : f32
    %4 = vector.broadcast %cst_3 : f32 to vector<64x128xf32>
    %5 = arith.mulf %3, %4 : vector<64x128xf32>
    %6 = vector.extract_strided_slice %2 {offsets = [0, 128], sizes = [64, 128], strides = [1, 1]} : vector<64x384xf32> to vector<64x128xf32>
    %7 = vector.extract_strided_slice %2 {offsets = [0, 256], sizes = [64, 128], strides = [1, 1]} : vector<64x384xf32> to vector<64x128xf32>
    %8 = vector.extract_strided_slice %5 {offsets = [0, 0], sizes = [64, 64], strides = [1, 1]} : vector<64x128xf32> to vector<64x64xf32>
    %9 = vector.shape_cast %8 : vector<64x64xf32> to vector<4x16x64xf32>
    %10 = vector.extract_strided_slice %6 {offsets = [0, 0], sizes = [64, 64], strides = [1, 1]} : vector<64x128xf32> to vector<64x64xf32>
    %11 = vector.shape_cast %10 : vector<64x64xf32> to vector<4x16x64xf32>
    %12 = vector.extract_strided_slice %7 {offsets = [0, 0], sizes = [64, 64], strides = [1, 1]} : vector<64x128xf32> to vector<64x64xf32>
    %13 = vector.shape_cast %12 : vector<64x64xf32> to vector<4x16x64xf32>
    "tpu.trace_start"() <{level = 10 : i32, message = "bqd,bkd->bqk"}> : () -> ()
    %cst_4 = arith.constant dense<0.000000e+00> : vector<4x16x16xf32>
    %14 = tpu.matmul %9, %11, %cst_4 {dimension_numbers = #tpu.dot_dimension_numbers<[2], [2], [1], [1], [0, 0, 0, 1, 1, 1], [0], [0]>} : vector<4x16x64xf32>, vector<4x16x64xf32>, vector<4x16x16xf32> -> vector<4x16x16xf32>
    "tpu.trace_stop"() : () -> ()
    %cst_5 = arith.constant dense<0xFF800000> : vector<4x16xf32>
    %15 = vector.multi_reduction <maximumf>, %14, %cst_5 [2] : vector<4x16x16xf32> to vector<4x16xf32>
    %16 = vector.shape_cast %15 : vector<4x16xf32> to vector<4x16x1xf32>
    %17 = vector.broadcast %16 : vector<4x16x1xf32> to vector<4x16x16xf32>
    %18 = arith.subf %14, %17 : vector<4x16x16xf32>
    %19 = math.exp %18 : vector<4x16x16xf32>
    %cst_6 = arith.constant dense<0.000000e+00> : vector<4x16xf32>
    %20 = vector.multi_reduction <add>, %19, %cst_6 [2] : vector<4x16x16xf32> to vector<4x16xf32>
    %21 = vector.shape_cast %20 : vector<4x16xf32> to vector<4x16x1xf32>
    %22 = vector.broadcast %21 : vector<4x16x1xf32> to vector<4x16x16xf32>
    %23 = arith.divf %19, %22 : vector<4x16x16xf32>
    "tpu.trace_start"() <{level = 10 : i32, message = "bqk,bkd->bqd"}> : () -> ()
    %cst_7 = arith.constant dense<0.000000e+00> : vector<4x16x64xf32>
    %24 = tpu.matmul %23, %13, %cst_7 {dimension_numbers = #tpu.dot_dimension_numbers<[2], [1], [1], [2], [0, 0, 0, 1, 1, 2], [0], [0]>} : vector<4x16x16xf32>, vector<4x16x64xf32>, vector<4x16x64xf32> -> vector<4x16x64xf32>
    "tpu.trace_stop"() : () -> ()
    %25 = vector.shape_cast %24 : vector<4x16x64xf32> to vector<64x64xf32>
    %c0_8 = arith.constant 0 : index
    %c0_9 = arith.constant 0 : index
    %26 = vector.load %arg6[%c0_8, %c0_9] : memref<64x128xf32, #tpu.memory_space<vmem>>, vector<64x64xf32>
    tpu.vector_store %arg6[%c0_8, %c0_9], %25 {strides = array<i32>} : memref<64x128xf32, #tpu.memory_space<vmem>>, vector<64x64xf32>,
    %27 = vector.extract_strided_slice %5 {offsets = [0, 64], sizes = [64, 64], strides = [1, 1]} : vector<64x128xf32> to vector<64x64xf32>
    %28 = vector.shape_cast %27 : vector<64x64xf32> to vector<4x16x64xf32>
    %29 = vector.extract_strided_slice %6 {offsets = [0, 64], sizes = [64, 64], strides = [1, 1]} : vector<64x128xf32> to vector<64x64xf32>
    %30 = vector.shape_cast %29 : vector<64x64xf32> to vector<4x16x64xf32>
    %31 = vector.extract_strided_slice %7 {offsets = [0, 64], sizes = [64, 64], strides = [1, 1]} : vector<64x128xf32> to vector<64x64xf32>
    %32 = vector.shape_cast %31 : vector<64x64xf32> to vector<4x16x64xf32>
    "tpu.trace_start"() <{level = 10 : i32, message = "bqd,bkd->bqk"}> : () -> ()
    %cst_10 = arith.constant dense<0.000000e+00> : vector<4x16x16xf32>
    %33 = tpu.matmul %28, %30, %cst_10 {dimension_numbers = #tpu.dot_dimension_numbers<[2], [2], [1], [1], [0, 0, 0, 1, 1, 1], [0], [0]>} : vector<4x16x64xf32>, vector<4x16x64xf32>, vector<4x16x16xf32> -> vector<4x16x16xf32>
    "tpu.trace_stop"() : () -> ()
    %cst_11 = arith.constant dense<0xFF800000> : vector<4x16xf32>
    %34 = vector.multi_reduction <maximumf>, %33, %cst_11 [2] : vector<4x16x16xf32> to vector<4x16xf32>
    %35 = vector.shape_cast %34 : vector<4x16xf32> to vector<4x16x1xf32>
    %36 = vector.broadcast %35 : vector<4x16x1xf32> to vector<4x16x16xf32>
    %37 = arith.subf %33, %36 : vector<4x16x16xf32>
    %38 = math.exp %37 : vector<4x16x16xf32>
    %cst_12 = arith.constant dense<0.000000e+00> : vector<4x16xf32>
    %39 = vector.multi_reduction <add>, %38, %cst_12 [2] : vector<4x16x16xf32> to vector<4x16xf32>
    %40 = vector.shape_cast %39 : vector<4x16xf32> to vector<4x16x1xf32>
    %41 = vector.broadcast %40 : vector<4x16x1xf32> to vector<4x16x16xf32>
    %42 = arith.divf %38, %41 : vector<4x16x16xf32>
    "tpu.trace_start"() <{level = 10 : i32, message = "bqk,bkd->bqd"}> : () -> ()
    %cst_13 = arith.constant dense<0.000000e+00> : vector<4x16x64xf32>
    %43 = tpu.matmul %42, %32, %cst_13 {dimension_numbers = #tpu.dot_dimension_numbers<[2], [1], [1], [2], [0, 0, 0, 1, 1, 2], [0], [0]>} : vector<4x16x16xf32>, vector<4x16x64xf32>, vector<4x16x64xf32> -> vector<4x16x64xf32>
    "tpu.trace_stop"() : () -> ()
    %44 = vector.shape_cast %43 : vector<4x16x64xf32> to vector<64x64xf32>
    %c0_14 = arith.constant 0 : index
    %c64 = arith.constant 64 : index
    %45 = vector.load %arg6[%c0_14, %c64] : memref<64x128xf32, #tpu.memory_space<vmem>>, vector<64x64xf32>
    tpu.vector_store %arg6[%c0_14, %c64], %44 {strides = array<i32>} : memref<64x128xf32, #tpu.memory_space<vmem>>, vector<64x64xf32>,
    %c0_15 = arith.constant 0 : index
    %c0_16 = arith.constant 0 : index
    %46 = vector.load %arg6[%c0_15, %c0_16] : memref<64x128xf32, #tpu.memory_space<vmem>>, vector<64x128xf32>
    %c0_17 = arith.constant 0 : index
    %c0_18 = arith.constant 0 : index
    %47 = vector.load %arg3[%c0_17, %c0_18] : memref<128x32xf32, #tpu.memory_space<vmem>>, vector<128x32xf32>
    %cst_19 = arith.constant dense<0.000000e+00> : vector<64x32xf32>
    %48 = tpu.matmul %46, %47, %cst_19 {dimension_numbers = #tpu.dot_dimension_numbers<[1], [0], [0], [1], [0, 0, 1, 1], [], []>} : vector<64x128xf32>, vector<128x32xf32>, vector<64x32xf32> -> vector<64x32xf32>
    %c0_20 = arith.constant 0 : index
    %c0_21 = arith.constant 0 : index
    %49 = vector.load %arg4[%c0_20, %c0_21] : memref<1x32xf32, #tpu.memory_space<vmem>>, vector<1x32xf32>
    %50 = vector.broadcast %49 : vector<1x32xf32> to vector<64x32xf32>
    %51 = arith.addf %48, %50 : vector<64x32xf32>
    %c0_22 = arith.constant 0 : index
    %c0_23 = arith.constant 0 : index
    %52 = vector.load %arg5[%c0_22, %c0_23] : memref<64x32xf32, #tpu.memory_space<vmem>>, vector<64x32xf32>
    tpu.vector_store %arg5[%c0_22, %c0_23], %51 {strides = array<i32>} : memref<64x32xf32, #tpu.memory_space<vmem>>, vector<64x32xf32>,
    return
  }
  func.func @transform_0(%arg0: i32) -> (i32, i32) {
    %c0_i32 = arith.constant 0 : i32
    %c0_i32_0 = arith.constant 0 : i32
    return %arg0, %c0_i32 : i32, i32
  }
  func.func @transform_1(%arg0: i32) -> (i32, i32) {
    %c0_i32 = arith.constant 0 : i32
    %c0_i32_0 = arith.constant 0 : i32
    %c0_i32_1 = arith.constant 0 : i32
    return %c0_i32, %c0_i32_0 : i32, i32
  }
  func.func @transform_2(%arg0: i32) -> (i32, i32) {
    %c0_i32 = arith.constant 0 : i32
    %c0_i32_0 = arith.constant 0 : i32
    %c0_i32_1 = arith.constant 0 : i32
    return %c0_i32, %c0_i32_0 : i32, i32
  }
  func.func @transform_3(%arg0: i32) -> (i32, i32) {
    %c0_i32 = arith.constant 0 : i32
    %c0_i32_0 = arith.constant 0 : i32
    %c0_i32_1 = arith.constant 0 : i32
    return %c0_i32, %c0_i32_0 : i32, i32
  }
  func.func @transform_4(%arg0: i32) -> (i32, i32) {
    %c0_i32 = arith.constant 0 : i32
    %c0_i32_0 = arith.constant 0 : i32
    return %arg0, %c0_i32 : i32, i32
  }
}

</mosaic_0001>

<bundles_post_ra>
// kernel: tpu_custom_call.1
= control target key start
LH: loop header
LB: loop body
LE: loop exit
PB: predicated region body
PF: predicated region fallthrough
CT: control target
= control target key end

     0   :  { %s2924_s15 = smov 0   ;;  %s3371_s0 = inlined_call_operand.vmem [shape: f32[128,32], index: 0, kind: input, shape index: {}]   ;;  %s3372_s1 = inlined_call_operand.vmem [shape: f32[32,384], index: 1, kind: input, shape index: {}]   ;;  %s3373_s2 = inlined_call_operand.vmem [shape: f32[128,32], index: 2, kind: input, shape index: {}]   ;;  %s3374_s3 = inlined_call_operand.vmem [shape: f32[1,32], index: 3, kind: input, shape index: {}]   ;;  %s3375_s4 = inlined_call_operand.vmem [shape: f32[128,32], index: 4, kind: output, shape index: {}]  }
   0x1 LB: > { %s2291_s16 = sadd.s32 4294967295, %s2895_s15   ;;  %p2295_p0 = scmp.ge.s32.totalorder %s2895_s15, 1  ;;  %s2895_s15 = sphi %s2924_s15, %s14_s15  }
   0x2   : > { %p163_p1 = scmp.lt.s32.totalorder %s2895_s15, 3 }
   0x4   : > { %p164_p2 = pnand %p2295_p0, %p163_p1 }
   0x5   : > { %v210_v0 = vld [vmem:[%s3372_s1 + $0x8] sm:$0xff] (!%p164_p2)  ;;  %v213_v1 = vld [vmem:[%s3372_s1 + $0x20] sm:$0xff] (!%p164_p2)  ;;  %s2296_s23 = sshll.u32 (!%p164_p2), %s2291_s16, 3  ;;  %v212_v4 = vld [vmem:[%s3372_s1 + $0x18] sm:$0xff] (!%p164_p2)  ;;  %v2897_v7 = vmov (!%p164_p2), 0.0   ;;  %vm221_vm0 = vcmask (!%p164_p2), 261120  }
   0x6   : > { %167 = sbr.rel (%p164_p2) target bundleno = 1903 (0x76f), region = 36  ;;  %v209_v2 = vld [vmem:[%s3372_s1] sm:$0xff] (!%p164_p2)  ;;  %v2643_v3 = vpack.c.bf16 (!%p164_p2), %v213_v1, %v210_v0  ;;  %v216_v5 = vld [vmem:[%s3372_s1 + $0x38] sm:$0xff] (!%p164_p2)  ;;  %v219_v6 = vld [vmem:[%s3372_s1 + $0x50] sm:$0xff] (!%p164_p2)  ;;  %310 = vmatprep.mubr.f32.mxu0 (!%p164_p2), %v2897_v7  ;;  %322 = vmatprep.mubr.f32.mxu1 (!%p164_p2), %v2897_v7  ;;  %p190_p3 = scmp.lt.s32.totalorder (!%p164_p2), %s2296_s23, 15  ;;  %vm472_vm1 = vcmask (!%p164_p2), 523264  }
   0x7   : > { %v2645_v8 = vpack.c.bf16 (!%p164_p2), %v212_v4, %v209_v2  ;;  %v2647_v9 = vpack.c.bf16 (!%p164_p2), %v219_v6, %v216_v5  ;;  %v215_v10 = vld [vmem:[%s3372_s1 + $0x30] sm:$0xff] (!%p164_p2)  ;;  %v218_v11 = vld [vmem:[%s3372_s1 + $0x48] sm:$0xff] (!%p164_p2)  ;;  %v217_v16 = vld [vmem:[%s3372_s1 + $0x40] sm:$0xff] (!%p164_p2)  ;;  %vm821_vm3 = vcmask (!%p164_p2), 130048   ;;  %s2898_s21 = smov (!%p164_p2), 64   ;;  %vm2082_vm4 = vcmask (!%p164_p2), 1048064  }
   0x8   : > { %v211_v12 = vld [vmem:[%s3372_s1 + $0x10] sm:$0xff] (!%p164_p2)  ;;  %2644 = vmatprep.subr.bf16.mxu0 (!%p164_p2), %v2643_v3  ;;  %2771 = vmatprep.subr.bf16.mxu1 (!%p164_p2), %v2643_v3  ;;  %v214_v13 = vld [vmem:[%s3372_s1 + $0x28] sm:$0xff] (!%p164_p2)  ;;  %v2649_v14 = vpack.c.bf16 (!%p164_p2), %v218_v11, %v215_v10  ;;  %v220_v17 = vld [vmem:[%s3372_s1 + $0x58] sm:$0xff] (!%p164_p2) }
   0x9   : > { %2646 = vmatpush1.bf16.msra.mxu0 (!%p164_p2), %v2645_v8  ;;  %2773 = vmatpush1.bf16.msra.mxu1 (!%p164_p2), %v2645_v8  ;;  %v2651_v15 = vpack.c.bf16 (!%p164_p2), %v214_v13, %v211_v12  ;;  %v2655_v20 = vpack.c.bf16 (!%p164_p2), %v220_v17, %v217_v16  ;;  %vm3014_vm2 = vmpackc.low (!%p164_p2), %vm472_vm1, %vm472_vm1 }
   0xa   : > { %2648 = vmatprep.subr.bf16.mxu0 (!%p164_p2), %v2647_v9  ;;  %2772 = vmatprep.subr.bf16.mxu1 (!%p164_p2), %v2647_v9 }
   0xd   : > { %s3379_s23 = smov (!%p190_p3, %s2296_s23), 15  ;;  %2650 = vmatpush1.bf16.msra.mxu0 %v2649_v14  ;;  %2774 = vmatpush1.bf16.msra.mxu1 %v2649_v14 }
   0xe   : > { %s2297_s12 = sshll.u32 %s3379_s23, 3  ;;  %2652 = vmatprep.subr.bf16.mxu1 %v2651_v15 }
   0xf   : > { %s2970_s16 = scalar_lea.vmem %s3371_s0, %s2297_s12  ;;  %s199_s10 = scalar_lea.vmem %s3375_s4, %s2297_s12 }
  0x10   : > { %v201_v18 = vld [vmem:[%s2970_s16] sm:$0xff]  ;;  %v203_v19 = vld [vmem:[%s2970_s16 + $0x10] sm:$0xff]  ;;  %v202_v21 = vld [vmem:[%s2970_s16 + $0x8] sm:$0xff] }
  0x11   : > { %2300 = vmatmul.mubr.msk.f32.vlgmr.msra.gmra.mrb[0].mxu0 %vm221_vm0, %v201_v18  ;;  %2302 = vmatmul.mubr.msk.f32.vlgmr.msra.gmra.mrb[0].mxu1 %vm221_vm0, %v203_v19  ;;  %v204_v22 = vld [vmem:[%s2970_s16 + $0x18] sm:$0xff]  ;;  %v205_v23 = vld [vmem:[%s2970_s16 + $0x20] sm:$0xff]  ;;  %v206_v24 = vld [vmem:[%s2970_s16 + $0x28] sm:$0xff] }
  0x12   : > { %316 = vmatprep.mubr.f32.mxu0 %v2897_v7  ;;  %328 = vmatprep.mubr.f32.mxu1 %v2897_v7  ;;  %v207_v25 = vld [vmem:[%s2970_s16 + $0x30] sm:$0xff]  ;;  %v208_v26 = vld [vmem:[%s2970_s16 + $0x38] sm:$0xff] }
  0x13   : > { %2654 = vmatpush3.bf16.msra.mxu1 %v2651_v15 }
  0x14   : > { %2656 = vmatprep.subr.bf16.mxu1 %v2655_v20 }
  0x15   : > { %2301 = vmatmul.mubr.msk.f32.gmra.mrb[2].mxu0 %vm221_vm0, %v202_v21  ;;  %2303 = vmatmul.mubr.msk.f32.gmra.mrb[2].mxu1 %vm221_vm0, %v204_v22 }
  0x16   : > { %334 = vmatprep.mubr.f32.mxu1 %v2897_v7 }
  0x17   : > { %2658 = vmatpush3.bf16.msra.mxu1 %v2655_v20 }
  0x19   : > { %2304 = vmatmul.mubr.msk.f32.gmra.mrb[4].mxu1 %vm221_vm0, %v205_v23 }
  0x1a   : > { %340 = vmatprep.mubr.f32.mxu1 %v2897_v7 }
  0x1d   : > { %2305 = vmatmul.mubr.msk.f32.gmra.mrb[6].mxu1 %vm221_vm0, %v206_v24 }
  0x1e   : > { %346 = vmatprep.mubr.f32.mxu1 %v2897_v7 }
  0x21   : > { %2306 = vmatmul.mubr.msk.f32.gmra.mrb[8].mxu1 %vm221_vm0, %v207_v25 }
  0x22   : > { %352 = vmatprep.mubr.f32.mxu1 %v2897_v7 }
  0x25   : > { %2307 = vmatmul.mubr.msk.f32.gmra.mrb[10].mxu1 %vm221_vm0, %v208_v26 }
  0x26   : > { %2475 = vmatprep.mubr.msk.f32.mxu1 %vm221_vm0, %v201_v18 }
  0x29   : > { %2476 = vmatmul.mubr.msk.f32.vlgmr.msra.gmra.mrb[12].mxu1 %vm221_vm0, %v202_v21 }
  0x2a   : > { %2478 = vmatprep.mubr.msk.f32.mxu1 %vm221_vm0, %v203_v19 }
  0x2d   : > { %2479 = vmatmul.mubr.msk.f32.gmra.mrb[14].mxu1 %vm221_vm0, %v204_v22 }
  0x2e   : > { %2481 = vmatprep.mubr.msk.f32.mxu1 %vm221_vm0, %v205_v23 }
  0x31   : > { %2482 = vmatmul.mubr.msk.f32.gmra.mrb[16].mxu1 %vm221_vm0, %v206_v24 }
  0x32   : > { %2484 = vmatprep.mubr.msk.f32.mxu1 %vm221_vm0, %v207_v25 }
  0x35   : > { %2485 = vmatmul.mubr.msk.f32.gmra.mrb[18].mxu1 %vm221_vm0, %v208_v26 }
  0xe4   : > { %v312_v27 = vpop.f32.mrb[0].mxu0  ;;  %v324_v28 = vpop.f32.mrb[0].mxu1 }
  0xe5   : > { %v3002_v29 = vmul.f32 0.125, %v312_v27  ;;  %v3004_v30 = vpop.f32.mrb[1].mxu0  ;;  %v3006_v31 = vpop.f32.mrb[1].mxu1  ;;  %v3048_v49 = vmul.f32 0.125, %v324_v28 }
  0xe7   : > { %2491 = vmatprep.mubr.msk.f32.mxu1 %vm472_vm1, %v3002_v29 }
  0xe8   : > { %v318_v32 = vpop.f32.mrb[2].mxu0  ;;  %v330_v33 = vpop.f32.mrb[2].mxu1 }
  0xe9   : > { %v3010_v34 = vpop.f32.mrb[3].mxu0  ;;  %v3018_v36 = vpop.f32.mrb[3].mxu1  ;;  %v3042_v46 = vmul.f32 0.125, %v318_v32  ;;  %v3064_v54 = vmul.f32 0.125, %v330_v33 }
  0xea   : > { %v2785_v37 = vpack.i.bf16 %v3010_v34, %v3004_v30  ;;  %v2659_v38 = vpack.c.bf16 %v3010_v34, %v3004_v30  ;;  %v2790_v39 = vpack.i.bf16 %v3018_v36, %v3006_v31  ;;  %v2665_v40 = vpack.c.bf16 %v3018_v36, %v3006_v31 }
  0xec   : > { %2661 = vmatprep.subr.msk.bf16.mxu1 %vm3014_vm2, %v2659_v38  ;;  %v336_v41 = vpop.f32.mrb[4].mxu1 }
  0xed   : > { %2664 = vmatpush3.bf16.xpose.msk.msra.mxu1 %vm3014_vm2, %v2659_v38  ;;  %v3032_v42 = vmul.f32 0.125, %v336_v41  ;;  %v3034_v43 = vpop.f32.mrb[5].mxu1 }
  0xee   : > { %2667 = vmatprep.subr.msk.bf16.mxu1 %vm3014_vm2, %v2665_v40 }
  0xef   : > { %2505 = vmatprep.mubr.msk.f32.mxu0 %vm472_vm1, %v3032_v42 }
  0xf0   : > { %v342_v44 = vpop.f32.mrb[6].mxu1 }
  0xf1   : > { %v3040_v45 = vpop.f32.mrb[7].mxu1  ;;  %v3070_v57 = vmul.f32 0.125, %v342_v44 }
  0xf2   : > { %v2795_v47 = vpack.i.bf16 %v3040_v45, %v3034_v43  ;;  %v2671_v48 = vpack.c.bf16 %v3040_v45, %v3034_v43 }
  0xf4   : > { %2492 = vmatmul.mubr.msk.f32.vlgmr.msra.gmra.mrb[20].mxu1 %vm472_vm1, %v3042_v46  ;;  %2673 = vmatprep.subr.msk.bf16.mxu0 %vm3014_vm2, %v2671_v48  ;;  %v348_v50 = vpop.f32.mrb[8].mxu1 }
  0xf5   : > { %2670 = vmatpush3.bf16.xpose.msk.msra.mxu1 %vm3014_vm2, %v2665_v40  ;;  %2498 = vmatprep.mubr.msk.f32.mxu1 %vm472_vm1, %v3048_v49  ;;  %v3058_v51 = vpop.f32.mrb[9].mxu1  ;;  %v3072_v58 = vmul.f32 0.125, %v348_v50 }
  0xf6   : > { %2676 = vmatpush3.bf16.xpose.msk.msra.mxu0 %vm3014_vm2, %v2671_v48 }
  0xf8   : > { %v354_v52 = vpop.f32.mrb[10].mxu1 }
  0xf9   : > { %v3062_v53 = vpop.f32.mrb[11].mxu1  ;;  %v3096_v1 = vmul.f32 0.125, %v354_v52 }
  0xfa   : > { %v2800_v55 = vpack.i.bf16 %v3062_v53, %v3058_v51  ;;  %v2677_v56 = vpack.c.bf16 %v3062_v53, %v3058_v51 }
  0xfc   : > { %2499 = vmatmul.mubr.msk.f32.vlgmr.msra.gmra.mrb[22].mxu1 %vm472_vm1, %v3064_v54  ;;  %2679 = vmatprep.subr.msk.bf16.mxu1 %vm3014_vm2, %v2677_v56  ;;  %v3078_v59 = vpop.f32.mrb[12].mxu1 }
  0xfd   : > { %2506 = vmatmul.mubr.msk.f32.vlgmr.msra.gmra.mrb[4].mxu0 %vm472_vm1, %v3070_v57  ;;  %2682 = vmatpush3.bf16.xpose.msk.msra.mxu1 %vm3014_vm2, %v2677_v56  ;;  %v3084_v60 = vpop.f32.mrb[13].mxu1 }
  0xfe   : > { %2512 = vmatprep.mubr.msk.f32.mxu1 %vm472_vm1, %v3072_v58  ;;  %v2805_v61 = vpack.i.bf16 %v3078_v59, %v3084_v60  ;;  %v2683_v62 = vpack.c.bf16 %v3078_v59, %v3084_v60 }
 0x100   : > { %v3092_v63 = vpop.f32.mrb[14].mxu1  ;;  %2684 = vmatprep.subr.bf16.mxu0 %v2683_v62 }
 0x101   : > { %v3094_v0 = vpop.f32.mrb[15].mxu1  ;;  %2686 = vmatpush3.bf16.msra.mxu0 %v2683_v62 }
 0x102   : > { %v2810_v2 = vpack.i.bf16 %v3092_v63, %v3094_v0  ;;  %v2687_v3 = vpack.c.bf16 %v3092_v63, %v3094_v0 }
 0x104   : > { %2513 = vmatmul.mubr.msk.f32.vlgmr.msra.gmra.mrb[24].mxu1 %vm472_vm1, %v3096_v1  ;;  %v3104_v4 = vpop.f32.mrb[16].mxu1  ;;  %2688 = vmatprep.subr.bf16.mxu1 %v2687_v3 }
 0x105   : > { %v3106_v5 = vpop.f32.mrb[17].mxu1  ;;  %2690 = vmatpush3.bf16.msra.mxu1 %v2687_v3 }
 0x106   : > { %v2815_v6 = vpack.i.bf16 %v3104_v4, %v3106_v5  ;;  %v3112_v7 = vpack.c.bf16 %v3104_v4, %v3106_v5 }
 0x108   : > { %v3114_v8 = vpop.f32.mrb[18].mxu1  ;;  %2692 = vmatprep.subr.bf16.mxu0 %v3112_v7 }
 0x109   : > { %v3117_v9 = vpop.f32.mrb[19].mxu1 }
 0x10a   : > { %v2820_v10 = vpack.i.bf16 %v3114_v8, %v3117_v9  ;;  %v3123_v11 = vpack.c.bf16 %v3114_v8, %v3117_v9 }
 0x10c   : > { %2696 = vmatprep.subr.bf16.mxu1 %v3123_v11 }
 0x1c7   : > { %v2493_v12 = vpop.f32.mrb[20].mxu1 }
 0x1c8   : > { %v551_v13 = vpop.f32.mrb[21].mxu1  ;;  %v825_v15 = vsel %vm821_vm3, %v2493_v12, -inf }
 0x1c9   : > { %v822_v14 = vsel %vm821_vm3, %v551_v13, -inf }
 0x1ca   : > { %823 = vmax.xlane.f32.xlu0 %v822_v14 }
 0x1ce   : > { %826 = vmax.xlane.f32.xlu0 %v825_v15 }
 0x1cf   : > { %v2500_v16 = vpop.f32.mrb[22].mxu1 }
 0x1d0   : > { %v2507_v17 = vpop.f32.mrb[4].mxu0  ;;  %v638_v18 = vpop.f32.mrb[23].mxu1  ;;  %v831_v22 = vsel %vm821_vm3, %v2500_v16, -inf }
 0x1d1   : > { %v725_v19 = vpop.f32.mrb[5].mxu0  ;;  %v828_v20 = vsel %vm821_vm3, %v638_v18, -inf  ;;  %v837_v25 = vsel %vm821_vm3, %v2507_v17, -inf }
 0x1d2   : > { %v834_v21 = vsel %vm821_vm3, %v725_v19, -inf  ;;  %829 = vmax.xlane.f32.xlu1 %v828_v20 }
 0x1d3   : > { %835 = vmax.xlane.f32.xlu0 %v834_v21 }
 0x1d6   : > { %832 = vmax.xlane.f32.xlu1 %v831_v22 }
 0x1d7   : > { %v2514_v23 = vpop.f32.mrb[24].mxu1 }
 0x1d8   : > { %v812_v24 = vpop.f32.mrb[25].mxu1  ;;  %v843_v27 = vsel %vm821_vm3, %v2514_v23, -inf }
 0x1d9   : > { %v840_v26 = vsel %vm821_vm3, %v812_v24, -inf }
 0x1da   : > { %838 = vmax.xlane.f32.xlu1 %v837_v25  ;;  %841 = vmax.xlane.f32.xlu0 %v840_v26 }
 0x1de   : > { %844 = vmax.xlane.f32.xlu1 %v843_v27 }
 0x1ef   : > { %2791 = vrot.lane.b32.xlu1 %v2790_v39, %s2898_s21 }
 0x1f0   : > { %2786 = vrot.lane.b32.xlu0 %v2785_v37, %s2898_s21 }
 0x1f3   : > { %2796 = vrot.lane.b32.xlu1 %v2795_v47, %s2898_s21 }
 0x1f7   : > { %1242 = vrot.lane.b32.xlu1 %v3002_v29, %s2898_s21 }
 0x257   : > { %v824_v28 = vpop.xlane.xlu0 %823 }
 0x258   : > { %v846_v32 = vsub.f32 %v551_v13, %v824_v28 }
 0x25a   : > { %v854_v33 = vmul.f32 1.442695, %v846_v32 }
 0x25b   : > { %v827_v38 = vpop.xlane.xlu0 %826 }
 0x25c   : > { %2825 = vpow2.f32 %v854_v33  ;;  %v847_v31 = vsub.f32 %v2493_v12, %v827_v38 }
 0x25e   : > { %v856_v36 = vmul.f32 1.442695, %v847_v31 }
 0x25f   : > { %v830_v39 = vpop.xlane.xlu1 %829 }
 0x260   : > { %2827 = vpow2.f32 %v856_v36  ;;  %v836_v40 = vpop.xlane.xlu0 %835  ;;  %v848_v30 = vsub.f32 %v638_v18, %v830_v39 }
 0x261   : > { %v850_v34 = vsub.f32 %v725_v19, %v836_v40 }
 0x262   : > { %v858_v37 = vmul.f32 1.442695, %v848_v30 }
 0x263   : > { %v862_v41 = vmul.f32 1.442695, %v850_v34  ;;  %v833_v44 = vpop.xlane.xlu1 %832 }
 0x264   : > { %2829 = vpow2.f32 %v858_v37  ;;  %v849_v43 = vsub.f32 %v2500_v16, %v833_v44 }
 0x265   : > { %2831 = vpow2.f32 %v862_v41 }
 0x266   : > { %v2826_v45 = vpop.eup %2825  ;;  %v860_v29 = vmul.f32 1.442695, %v849_v43 }
 0x267   : > { %v839_v47 = vpop.xlane.xlu1 %838  ;;  %v842_v48 = vpop.xlane.xlu0 %841  ;;  %v870_v50 = vsel %vm821_vm3, %v2826_v45, 0.0 }
 0x268   : > { %2833 = vpow2.f32 %v860_v29  ;;  %v851_v52 = vsub.f32 %v2507_v17, %v839_v47  ;;  %v852_v56 = vsub.f32 %v812_v24, %v842_v48  ;;  %871 = vadd.xlane.f32.xlu0 %v870_v50 }
 0x26a   : > { %v2828_v62 = vpop.eup %2827  ;;  %v864_v3 = vmul.f32 1.442695, %v851_v52  ;;  %v866_v12 = vmul.f32 1.442695, %v852_v56 }
 0x26b   : > { %v845_v13 = vpop.xlane.xlu1 %844  ;;  %v873_v14 = vsel %vm821_vm3, %v2828_v62, 0.0  ;;  %v2787_v53 = vpop.permute.xlu0 %2786 }
 0x26c   : > { %2835 = vpow2.f32 %v864_v3  ;;  %v853_v15 = vsub.f32 %v2514_v23, %v845_v13  ;;  %874 = vadd.xlane.f32.xlu1 %v873_v14  ;;  %v2789_v31 = vunpack.i.h.bf16 %v2787_v53 }
 0x26d   : > { %2837 = vpow2.f32 %v866_v12 }
 0x26e   : > { %v2830_v16 = vpop.eup %2829  ;;  %v868_v18 = vmul.f32 1.442695, %v853_v15 }
 0x26f   : > { %v876_v19 = vsel %vm821_vm3, %v2830_v16, 0.0  ;;  %v3151_v20 = vpop.eup %2831  ;;  %v2792_v51 = vpop.permute.xlu1 %2791 }
 0x270   : > { %2839 = vpow2.f32 %v868_v18  ;;  %877 = vadd.xlane.f32.xlu0 %v876_v19  ;;  %v882_v22 = vsel %vm821_vm3, %v3151_v20, 0.0  ;;  %v2794_v44 = vunpack.i.h.bf16 %v2792_v51  ;;  %v2793_v43 = vunpack.i.l.bf16 %v2792_v51 }
 0x272   : > { %v2834_v17 = vpop.eup %2833  ;;  %v2705_v52 = vpack.c.bf16 %v2794_v44, %v2793_v43 }
 0x273   : > { %v879_v21 = vsel %vm821_vm3, %v2834_v17, 0.0 }
 0x274   : > { %880 = vadd.xlane.f32.xlu1 %v879_v21  ;;  %883 = vadd.xlane.f32.xlu0 %v882_v22 }
 0x276   : > { %v3156_v24 = vpop.eup %2835 }
 0x277   : > { %v3158_v23 = vpop.eup %2837  ;;  %v885_v25 = vsel %vm821_vm3, %v3156_v24, 0.0 }
 0x278   : > { %886 = vadd.xlane.f32.xlu1 %v885_v25  ;;  %v888_v26 = vsel %vm821_vm3, %v3158_v23, 0.0 }
 0x279   : > { %889 = vadd.xlane.f32.xlu0 %v888_v26 }
 0x27a   : > { %v3164_v27 = vpop.eup %2839 }
 0x27b   : > { %v891_v28 = vsel %vm821_vm3, %v3164_v27, 0.0 }
 0x27c   : > { %892 = vadd.xlane.f32.xlu1 %v891_v28 }
 0x28d   : > { %2801 = vrot.lane.b32.xlu1 %v2800_v55, %s2898_s21 }
 0x28f   : > { %1244 = vrot.lane.b32.xlu0 %v3042_v46, %s2898_s21  ;;  %v2797_v46 = vpop.permute.xlu1 %2796 }
 0x290   : > { %v2799_v56 = vunpack.i.h.bf16 %v2797_v46 }
 0x291   : > { %1335 = vrot.lane.b32.xlu1 %v3064_v54, %s2898_s21 }
 0x293   : > { %1333 = vrot.lane.b32.xlu0 %v3048_v49, %s2898_s21  ;;  %v1243_v55 = vpop.permute.xlu1 %1242 }
 0x295   : > { %1426 = vrot.lane.b32.xlu1 %v3070_v57, %s2898_s21 }
 0x297   : > { %1424 = vrot.lane.b32.xlu0 %v3032_v42, %s2898_s21 }
 0x299   : > { %1517 = vrot.lane.b32.xlu1 %v3096_v1, %s2898_s21  ;;  %v2788_v1 = vunpack.i.l.bf16 %v2787_v53 }
 0x29b   : > { %1515 = vrot.lane.b32.xlu0 %v3072_v58, %s2898_s21  ;;  %v2699_v30 = vpack.c.bf16 %v2789_v31, %v2788_v1 }
 0x2f5   : > { %v872_v54 = vpop.xlane.xlu0 %871 }
 0x2f6   : > { %2841 = vrcp.f32 %v872_v54 }
 0x2f9   : > { %v875_v32 = vpop.xlane.xlu1 %874 }
 0x2fa   : > { %2843 = vrcp.f32 %v875_v32 }
 0x2fd   : > { %v878_v49 = vpop.xlane.xlu0 %877 }
 0x2fe   : > { %2845 = vrcp.f32 %v878_v49 }
 0x300   : > { %v2842_v57 = vpop.eup %2841 }
 0x301   : > { %v881_v33 = vpop.xlane.xlu1 %880  ;;  %v884_v38 = vpop.xlane.xlu0 %883  ;;  %v895_v42 = vmul.f32 %v2842_v57, %v2826_v45 }
 0x302   : > { %2847 = vrcp.f32 %v881_v33 }
 0x303   : > { %2849 = vrcp.f32 %v884_v38  ;;  %2519 = vmatprep.mubr.msk.f32.mxu0 %vm821_vm3, %v895_v42 }
 0x304   : > { %v2844_v58 = vpop.eup %2843 }
 0x305   : > { %v897_v36 = vmul.f32 %v2844_v58, %v2828_v62  ;;  %v887_v39 = vpop.xlane.xlu1 %886  ;;  %v2798_v62 = vunpack.i.l.bf16 %v2797_v46 }
 0x306   : > { %2851 = vrcp.f32 %v887_v39  ;;  %v890_v40 = vpop.xlane.xlu0 %889 }
 0x307   : > { %2853 = vrcp.f32 %v890_v40  ;;  %2520 = vmatmul.mubr.msk.f32.vlgmr.msra.gmra.mrb[6].mxu0 %vm821_vm3, %v897_v36  ;;  %v2711_v15 = vpack.c.bf16 %v2799_v56, %v2798_v62 }
 0x308   : > { %v2846_v34 = vpop.eup %2845  ;;  %2694 = vmatpush3.bf16.msra.mxu0 %v3112_v7 }
 0x309   : > { %2701 = vmatprep.subr.msk.bf16.mxu0 %vm3014_vm2, %v2699_v30  ;;  %v893_v37 = vpop.xlane.xlu1 %892  ;;  %v899_v41 = vmul.f32 %v2846_v34, %v2830_v16 }
 0x30a   : > { %2855 = vrcp.f32 %v893_v37  ;;  %v1245_v48 = vpop.permute.xlu0 %1244 }
 0x30b   : > { %2526 = vmatprep.mubr.msk.f32.mxu1 %vm821_vm3, %v899_v41 }
 0x30c   : > { %v2848_v45 = vpop.eup %2847 }
 0x30d   : > { %v2850_v29 = vpop.eup %2849  ;;  %v901_v47 = vmul.f32 %v2848_v45, %v2834_v17  ;;  %v2802_v13 = vpop.permute.xlu1 %2801 }
 0x30e   : > { %v903_v50 = vmul.f32 %v2850_v29, %v3151_v20  ;;  %v2804_v18 = vunpack.i.h.bf16 %v2802_v13  ;;  %v2803_v19 = vunpack.i.l.bf16 %v2802_v13  ;;  %v1334_v20 = vpop.permute.xlu0 %1333 }
 0x30f   : > { %2527 = vmatmul.mubr.msk.f32.vlgmr.msra.gmra.mrb[26].mxu1 %vm821_vm3, %v901_v47 }
 0x310   : > { %v2852_v7 = vpop.eup %2851  ;;  %2533 = vmatprep.mubr.msk.f32.mxu0 %vm821_vm3, %v903_v50  ;;  %2698 = vmatpush3.bf16.msra.mxu1 %v3123_v11  ;;  %v2717_v17 = vpack.c.bf16 %v2804_v18, %v2803_v19 }
 0x311   : > { %v2854_v3 = vpop.eup %2853  ;;  %v905_v12 = vmul.f32 %v2852_v7, %v3156_v24  ;;  %2707 = vmatprep.subr.msk.bf16.mxu1 %vm3014_vm2, %v2705_v52  ;;  %v1336_v22 = vpop.permute.xlu1 %1335 }
 0x312   : > { %v907_v14 = vmul.f32 %v2854_v3, %v3158_v23  ;;  %v1425_v21 = vpop.permute.xlu0 %1424 }
 0x313   : > { %2534 = vmatmul.mubr.msk.f32.vlgmr.msra.gmra.mrb[8].mxu0 %vm821_vm3, %v905_v12 }
 0x314   : > { %v2856_v16 = vpop.eup %2855  ;;  %2540 = vmatprep.mubr.msk.f32.mxu1 %vm821_vm3, %v907_v14  ;;  %2704 = vmatpush3.bf16.xpose.msk.msra.mxu0 %vm3014_vm2, %v2699_v30 }
 0x315   : > { %v909_v11 = vmul.f32 %v2856_v16, %v3164_v27  ;;  %2547 = vmatprep.mubr.msk.f32.mxu0 %vm472_vm1, %v1243_v55  ;;  %2713 = vmatprep.subr.msk.bf16.mxu0 %vm3014_vm2, %v2711_v15  ;;  %v1427_v23 = vpop.permute.xlu1 %1426 }
 0x316   : > { %v1516_v24 = vpop.permute.xlu0 %1515 }
 0x317   : > { %2541 = vmatmul.mubr.msk.f32.vlgmr.msra.gmra.mrb[28].mxu1 %vm821_vm3, %v909_v11 }
 0x318   : > { %2554 = vmatprep.mubr.msk.f32.mxu1 %vm472_vm1, %v1334_v20 }
 0x319   : > { %2710 = vmatpush3.bf16.xpose.msk.msra.mxu1 %vm3014_vm2, %v2705_v52  ;;  %v1518_v25 = vpop.permute.xlu1 %1517 }
 0x31a   : > { %2719 = vmatprep.subr.msk.bf16.mxu1 %vm3014_vm2, %v2717_v17 }
 0x31b   : > { %2548 = vmatmul.mubr.msk.f32.vlgmr.msra.gmra.mrb[10].mxu0 %vm472_vm1, %v1245_v48 }
 0x31c   : > { %2716 = vmatpush3.bf16.xpose.msk.msra.mxu0 %vm3014_vm2, %v2711_v15  ;;  %2561 = vmatprep.mubr.msk.f32.mxu0 %vm472_vm1, %v1425_v21 }
 0x320   : > { %2555 = vmatmul.mubr.msk.f32.vlgmr.msra.gmra.mrb[30].mxu1 %vm472_vm1, %v1336_v22 }
 0x321   : > { %2722 = vmatpush3.bf16.xpose.msk.msra.mxu1 %vm3014_vm2, %v2717_v17  ;;  %2568 = vmatprep.mubr.msk.f32.mxu1 %vm472_vm1, %v1516_v24 }
 0x323   : > { %2562 = vmatmul.mubr.msk.f32.vlgmr.msra.gmra.mrb[12].mxu0 %vm472_vm1, %v1427_v23 }
 0x328   : > { %2569 = vmatmul.mubr.msk.f32.vlgmr.msra.gmra.mrb[32].mxu1 %vm472_vm1, %v1518_v25 }
 0x3da   : > { %v2521_v26 = vpop.f32.mrb[6].mxu0 }
 0x3db   : > { %1235 = vst.msk [vmem:[#allocation2 + $0x8] sm:$0xff] %vm472_vm1, %v2521_v26  ;;  %v982_v27 = vpop.f32.mrb[7].mxu0 }
 0x3dc   : > { %1234 = vst.msk [vmem:[#allocation2] sm:$0xff] %vm472_vm1, %v982_v27 }
 0x3e2   : > { %v2528_v28 = vpop.f32.mrb[26].mxu1 }
 0x3e3   : > { %1237 = vst.msk [vmem:[#allocation2 + $0x18] sm:$0xff] %vm472_vm1, %v2528_v28  ;;  %v1063_v51 = vpop.f32.mrb[27].mxu1 }
 0x3e4   : > { %1236 = vst.msk [vmem:[#allocation2 + $0x10] sm:$0xff] %vm472_vm1, %v1063_v51 }
 0x3e6   : > { %v2535_v35 = vpop.f32.mrb[8].mxu0 }
 0x3e7   : > { %1239 = vst.msk [vmem:[#allocation2 + $0x28] sm:$0xff] %vm472_vm1, %v2535_v35  ;;  %v1144_v46 = vpop.f32.mrb[9].mxu0 }
 0x3e8   : > { %1238 = vst.msk [vmem:[#allocation2 + $0x20] sm:$0xff] %vm472_vm1, %v1144_v46 }
 0x3ea   : > { %v2542_v53 = vpop.f32.mrb[28].mxu1 }
 0x3eb   : > { %1241 = vst.msk [vmem:[#allocation2 + $0x38] sm:$0xff] %vm472_vm1, %v2542_v53  ;;  %v1225_v55 = vpop.f32.mrb[29].mxu1 }
 0x3ec   : > { %1240 = vst.msk [vmem:[#allocation2 + $0x30] sm:$0xff] %vm472_vm1, %v1225_v55 }
 0x3ee   : > { %v2549_v54 = vpop.f32.mrb[10].mxu0 }
 0x3ef   : > { %v1324_v32 = vpop.f32.mrb[11].mxu0  ;;  %v1609_v49 = vsel %vm821_vm3, %v2549_v54, -inf }
 0x3f0   : > { %1610 = vmax.xlane.f32.xlu1 %v1609_v49  ;;  %v1606_v57 = vsel %vm821_vm3, %v1324_v32, -inf }
 0x3f1   : > { %1607 = vmax.xlane.f32.xlu0 %v1606_v57 }
 0x3f3   : > { %v2556_v33 = vpop.f32.mrb[30].mxu1 }
 0x3f4   : > { %v1415_v38 = vpop.f32.mrb[31].mxu1  ;;  %v1615_v42 = vsel %vm821_vm3, %v2556_v33, -inf }
 0x3f5   : > { %1616 = vmax.xlane.f32.xlu0 %v1615_v42  ;;  %v1612_v36 = vsel %vm821_vm3, %v1415_v38, -inf }
 0x3f6   : > { %v2563_v31 = vpop.f32.mrb[12].mxu0 }
 0x3f7   : > { %v1506_v1 = vpop.f32.mrb[13].mxu0  ;;  %v1621_v58 = vsel %vm821_vm3, %v2563_v31, -inf }
 0x3f8   : > { %1622 = vmax.xlane.f32.xlu1 %v1621_v58  ;;  %v1618_v34 = vsel %vm821_vm3, %v1506_v1, -inf }
 0x3f9   : > { %1613 = vmax.xlane.f32.xlu0 %v1612_v36 }
 0x3fb   : > { %v2570_v39 = vpop.f32.mrb[32].mxu1 }
 0x3fc   : > { %v1597_v40 = vpop.f32.mrb[33].mxu1  ;;  %v1627_v30 = vsel %vm821_vm3, %v2570_v39, -inf }
 0x3fd   : > { %1628 = vmax.xlane.f32.xlu1 %v1627_v30  ;;  %1619 = vmax.xlane.f32.xlu0 %v1618_v34  ;;  %v1624_v37 = vsel %vm821_vm3, %v1597_v40, -inf }
 0x401   : > { %1625 = vmax.xlane.f32.xlu0 %v1624_v37 }
 0x47d   : > { %v1611_v41 = vpop.xlane.xlu1 %1610 }
 0x47e   : > { %v1631_v44 = vsub.f32 %v2549_v54, %v1611_v41  ;;  %v1608_v43 = vpop.xlane.xlu0 %1607 }
 0x47f   : > { %v1630_v45 = vsub.f32 %v1324_v32, %v1608_v43 }
 0x480   : > { %v1640_v29 = vmul.f32 1.442695, %v1631_v44 }
 0x481   : > { %v1638_v47 = vmul.f32 1.442695, %v1630_v45 }
 0x482   : > { %2857 = vpow2.f32 %v1640_v29  ;;  %v1617_v48 = vpop.xlane.xlu0 %1616 }
 0x483   : > { %2859 = vpow2.f32 %v1638_v47  ;;  %v1633_v50 = vsub.f32 %v2556_v33, %v1617_v48 }
 0x485   : > { %v1644_v52 = vmul.f32 1.442695, %v1633_v50  ;;  %v1623_v56 = vpop.xlane.xlu1 %1622 }
 0x486   : > { %v1635_v62 = vsub.f32 %v2563_v31, %v1623_v56  ;;  %v1614_v7 = vpop.xlane.xlu0 %1613 }
 0x487   : > { %2861 = vpow2.f32 %v1644_v52  ;;  %v1632_v3 = vsub.f32 %v1415_v38, %v1614_v7 }
 0x488   : > { %v1648_v12 = vmul.f32 1.442695, %v1635_v62 }
 0x489   : > { %v1642_v13 = vmul.f32 1.442695, %v1632_v3 }
 0x48a   : > { %2863 = vpow2.f32 %v1648_v12  ;;  %v1629_v14 = vpop.xlane.xlu1 %1628  ;;  %v1620_v15 = vpop.xlane.xlu0 %1619 }
 0x48b   : > { %2865 = vpow2.f32 %v1642_v13  ;;  %v1637_v16 = vsub.f32 %v2570_v39, %v1629_v14  ;;  %v1634_v18 = vsub.f32 %v1506_v1, %v1620_v15  ;;  %v2099_v15 = vld [vmem:[%s3373_s2] sm:$0xff] }
 0x48c   : > { %v3240_v19 = vpop.eup %2857 }
 0x48d   : > { %v2860_v20 = vpop.eup %2859  ;;  %v1652_v11 = vmul.f32 1.442695, %v1637_v16  ;;  %v1646_v17 = vmul.f32 1.442695, %v1634_v18  ;;  %v1657_v21 = vsel %vm821_vm3, %v3240_v19, 0.0  ;;  %v2100_v16 = vld [vmem:[%s3373_s2 + $0x8] sm:$0xff] }
 0x48e   : > { %1658 = vadd.xlane.f32.xlu1 %v1657_v21  ;;  %v1626_v22 = vpop.xlane.xlu0 %1625  ;;  %v1654_v24 = vsel %vm821_vm3, %v2860_v20, 0.0  ;;  %v2101_v18 = vld [vmem:[%s3373_s2 + $0x10] sm:$0xff]  ;;  %v2104_v21 = vld [vmem:[%s3373_s2 + $0x28] sm:$0xff] }
 0x48f   : > { %2867 = vpow2.f32 %v1652_v11  ;;  %v1636_v23 = vsub.f32 %v1597_v40, %v1626_v22  ;;  %1655 = vadd.xlane.f32.xlu0 %v1654_v24  ;;  %v2105_v24 = vld [vmem:[%s3373_s2 + $0x30] sm:$0xff] }
 0x490   : > { %2869 = vpow2.f32 %v1646_v17  ;;  %v2103_v17 = vld [vmem:[%s3373_s2 + $0x20] sm:$0xff] }
 0x491   : > { %v2862_v25 = vpop.eup %2861  ;;  %v1650_v26 = vmul.f32 1.442695, %v1636_v23  ;;  %v2747_v22 = vpack.c.bf16 %v2104_v21, %v2103_v17  ;;  %v2106_v23 = vld [vmem:[%s3373_s2 + $0x38] sm:$0xff] }
 0x492   : > { %v1663_v27 = vsel %vm821_vm3, %v2862_v25, 0.0 }
 0x493   : > { %2871 = vpow2.f32 %v1650_v26  ;;  %1664 = vadd.xlane.f32.xlu1 %v1663_v27  ;;  %v2107_v26 = vld [vmem:[%s3373_s2 + $0x40] sm:$0xff]  ;;  %v2108_v27 = vld [vmem:[%s3373_s2 + $0x48] sm:$0xff] }
 0x494   : > { %v3246_v28 = vpop.eup %2863 }
 0x495   : > { %v2866_v51 = vpop.eup %2865  ;;  %v1669_v35 = vsel %vm821_vm3, %v3246_v28, 0.0 }
 0x496   : > { %v1660_v46 = vsel %vm821_vm3, %v2866_v51, 0.0 }
 0x497   : > { %1670 = vadd.xlane.f32.xlu1 %v1669_v35  ;;  %1661 = vadd.xlane.f32.xlu0 %v1660_v46  ;;  %v2110_v35 = vld [vmem:[%s3373_s2 + $0x58] sm:$0xff] }
 0x499   : > { %v3251_v53 = vpop.eup %2867 }
 0x49a   : > { %v3253_v55 = vpop.eup %2869  ;;  %v1675_v54 = vsel %vm821_vm3, %v3251_v53, 0.0 }
 0x49b   : > { %1676 = vadd.xlane.f32.xlu1 %v1675_v54  ;;  %v1666_v32 = vsel %vm821_vm3, %v3253_v55, 0.0 }
 0x49c   : > { %1667 = vadd.xlane.f32.xlu0 %v1666_v32  ;;  %v2113_v32 = vld [vmem:[%s3373_s2 + $0x70] sm:$0xff] }
 0x49d   : > { %v2872_v49 = vpop.eup %2871 }
 0x49e   : > { %v1672_v57 = vsel %vm821_vm3, %v2872_v49, 0.0 }
 0x4a0   : > { %1673 = vadd.xlane.f32.xlu0 %v1672_v57 }
 0x4ac   : > { %2811 = vrot.lane.b32.xlu1 %v2810_v2, %s2898_s21 }
 0x4b0   : > { %2816 = vrot.lane.b32.xlu1 %v2815_v6, %s2898_s21 }
 0x4b4   : > { %2821 = vrot.lane.b32.xlu1 %v2820_v10, %s2898_s21 }
 0x4b6   : > { %2806 = vrot.lane.b32.xlu0 %v2805_v61, %s2898_s21 }
 0x51b   : > { %v1659_v33 = vpop.xlane.xlu1 %1658 }
 0x51c   : > { %v1656_v38 = vpop.xlane.xlu0 %1655 }
 0x51d   : > { %2873 = vrcp.f32 %v1656_v38 }
 0x520   : > { %v1665_v63 = vpop.xlane.xlu1 %1664 }
 0x521   : > { %2875 = vrcp.f32 %v1665_v63 }
 0x524   : > { %v1671_v0 = vpop.xlane.xlu1 %1670  ;;  %v1662_v2 = vpop.xlane.xlu0 %1661 }
 0x525   : > { %2877 = vrcp.f32 %v1662_v2 }
 0x526   : > { %2879 = vrcp.f32 %v1659_v33 }
 0x527   : > { %v2874_v4 = vpop.eup %2873 }
 0x528   : > { %v1677_v5 = vpop.xlane.xlu1 %1676  ;;  %v1679_v6 = vmul.f32 %v2874_v4, %v2860_v20  ;;  %v2102_v20 = vld [vmem:[%s3373_s2 + $0x18] sm:$0xff] }
 0x529   : > { %v1668_v42 = vpop.xlane.xlu0 %1667  ;;  %v2743_v11 = vpack.c.bf16 %v2102_v20, %v2101_v18 }
 0x52a   : > { %2575 = vmatprep.mubr.msk.f32.mxu0 %vm821_vm3, %v1679_v6  ;;  %2881 = vrcp.f32 %v1668_v42 }
 0x52b   : > { %2883 = vrcp.f32 %v1677_v5  ;;  %v2876_v9 = vpop.eup %2875 }
 0x52c   : > { %v2812_v8 = vpop.permute.xlu1 %2811  ;;  %v1685_v37 = vmul.f32 %v2876_v9, %v2862_v25  ;;  %v2751_v25 = vpack.c.bf16 %v2106_v23, %v2105_v24 }
 0x52d   : > { %v2814_v59 = vunpack.i.h.bf16 %v2812_v8  ;;  %v2813_v60 = vunpack.i.l.bf16 %v2812_v8  ;;  %v1674_v61 = vpop.xlane.xlu0 %1673 }
 0x52e   : > { %2885 = vrcp.f32 %v1674_v61 }
 0x52f   : > { %2887 = vrcp.f32 %v1671_v0  ;;  %v2727_v10 = vpack.c.bf16 %v2814_v59, %v2813_v60  ;;  %v2878_v31 = vpop.eup %2877 }
 0x530   : > { %v2817_v1 = vpop.permute.xlu1 %2816  ;;  %v1683_v36 = vmul.f32 %v2878_v31, %v2866_v51  ;;  %v2880_v43 = vpop.eup %2879  ;;  %v2109_v51 = vld [vmem:[%s3373_s2 + $0x50] sm:$0xff] }
 0x531   : > { %v2807_v58 = vpop.permute.xlu0 %2806  ;;  %2728 = vmatprep.subr.bf16.mxu1 %v2727_v10  ;;  %v2819_v39 = vunpack.i.h.bf16 %v2817_v1  ;;  %v2818_v40 = vunpack.i.l.bf16 %v2817_v1  ;;  %v1681_v62 = vmul.f32 %v2880_v43, %v3240_v19  ;;  %v2739_v19 = vpack.c.bf16 %v2100_v16, %v2099_v15 }
 0x532   : > { %v2809_v30 = vunpack.i.h.bf16 %v2807_v58  ;;  %v2808_v34 = vunpack.i.l.bf16 %v2807_v58  ;;  %2730 = vmatpush3.bf16.msra.mxu1 %v2727_v10  ;;  %2582 = vmatprep.mubr.msk.f32.mxu1 %vm821_vm3, %v1683_v36  ;;  %v2759_v46 = vpack.c.bf16 %v2110_v35, %v2109_v51 }
 0x533   : > { %v2731_v48 = vpack.c.bf16 %v2819_v39, %v2818_v40 }
 0x534   : > { %v2723_v41 = vpack.c.bf16 %v2809_v30, %v2808_v34  ;;  %v2822_v44 = vpop.permute.xlu1 %2821  ;;  %v2882_v47 = vpop.eup %2881 }
 0x535   : > { %v2824_v45 = vunpack.i.h.bf16 %v2822_v44  ;;  %v2823_v29 = vunpack.i.l.bf16 %v2822_v44  ;;  %2583 = vmatmul.mubr.msk.f32.vlgmr.msra.gmra.mrb[34].mxu1 %vm821_vm3, %v1685_v37  ;;  %v2884_v50 = vpop.eup %2883  ;;  %v1687_v3 = vmul.f32 %v2882_v47, %v3253_v55  ;;  %v2112_v55 = vld [vmem:[%s3373_s2 + $0x68] sm:$0xff] }
 0x536   : > { %2724 = vmatprep.subr.bf16.mxu0 %v2723_v41  ;;  %v1693_v13 = vmul.f32 %v2884_v50, %v3251_v53  ;;  %v2111_v53 = vld [vmem:[%s3373_s2 + $0x60] sm:$0xff] }
 0x537   : > { %v2735_v52 = vpack.c.bf16 %v2824_v45, %v2823_v29  ;;  %2726 = vmatpush3.bf16.msra.mxu0 %v2723_v41  ;;  %v2763_v54 = vpack.c.bf16 %v2112_v55, %v2111_v53  ;;  %v2364_v41 = vld [vmem:[%s3374_s3] ss:$0 sm:$0xff] }
 0x538   : > { %v2886_v56 = vpop.eup %2885  ;;  %2732 = vmatprep.subr.bf16.mxu0 %v2731_v48 }
 0x539   : > { %v2888_v7 = vpop.eup %2887  ;;  %2736 = vmatprep.subr.bf16.mxu1 %v2735_v52  ;;  %v1691_v12 = vmul.f32 %v2886_v56, %v2872_v49  ;;  %v2114_v49 = vld [vmem:[%s3373_s2 + $0x78] sm:$0xff] }
 0x53a   : > { %2576 = vmatmul.mubr.msk.f32.vlgmr.msra.gmra.mrb[14].mxu0 %vm821_vm3, %v1681_v62  ;;  %2738 = vmatpush3.bf16.msra.mxu1 %v2735_v52  ;;  %v1689_v14 = vmul.f32 %v2888_v7, %v3246_v28  ;;  %v2755_v28 = vpack.c.bf16 %v2108_v27, %v2107_v26  ;;  %v2767_v57 = vpack.c.bf16 %v2114_v49, %v2113_v32 }
 0x53b   : > { %2734 = vmatpush3.bf16.msra.mxu0 %v2731_v48  ;;  %2589 = vmatprep.mubr.msk.f32.mxu0 %vm821_vm3, %v1687_v3 }
 0x53c   : > { %2596 = vmatprep.mubr.msk.f32.mxu1 %vm821_vm3, %v1691_v12  ;;  %2740 = vmatprep.subr.bf16.mxu0 %v2739_v19 }
 0x53d   : > { %2597 = vmatmul.mubr.msk.f32.vlgmr.msra.gmra.mrb[36].mxu1 %vm821_vm3, %v1693_v13 }
 0x53e   : > { %2590 = vmatmul.mubr.msk.f32.vlgmr.msra.gmra.mrb[16].mxu0 %vm821_vm3, %v1689_v14 }
 0x53f   : > { %2742 = vmatpush3.bf16.msra.mxu0 %v2739_v19 }
 0x540   : > { %2744 = vmatprep.subr.bf16.mxu0 %v2743_v11 }
 0x543   : > { %2746 = vmatpush3.bf16.msra.mxu0 %v2743_v11 }
 0x544   : > { %2748 = vmatprep.subr.bf16.mxu0 %v2747_v22 }
 0x547   : > { %2750 = vmatpush3.bf16.msra.mxu0 %v2747_v22 }
 0x548   : > { %2752 = vmatprep.subr.bf16.mxu0 %v2751_v25 }
 0x54b   : > { %2754 = vmatpush3.bf16.msra.mxu0 %v2751_v25 }
 0x54c   : > { %2756 = vmatprep.subr.bf16.mxu0 %v2755_v28 }
 0x54f   : > { %2758 = vmatpush3.bf16.msra.mxu0 %v2755_v28 }
 0x550   : > { %2760 = vmatprep.subr.bf16.mxu0 %v2759_v46 }
 0x553   : > { %2762 = vmatpush3.bf16.msra.mxu0 %v2759_v46 }
 0x554   : > { %2764 = vmatprep.subr.bf16.mxu0 %v2763_v54 }
 0x557   : > { %2766 = vmatpush3.bf16.msra.mxu0 %v2763_v54 }
 0x558   : > { %2768 = vmatprep.subr.bf16.mxu0 %v2767_v57 }
 0x55b   : > { %2770 = vmatpush3.bf16.msra.mxu0 %v2767_v57 }
 0x608   : > { %v2584_v33 = vpop.f32.mrb[34].mxu1 }
 0x609   : > { %v1863_v38 = vpop.f32.mrb[35].mxu1 }
 0x60d   : > { %v2577_v63 = vpop.f32.mrb[14].mxu0 }
 0x60e   : > { %2060 = vrot.lane.b32.xlu1 %v2577_v63, %s2898_s21  ;;  %v1774_v0 = vpop.f32.mrb[15].mxu0 }
 0x60f   : > { %2058 = vrot.lane.b32.xlu0 %v1774_v0, %s2898_s21 }
 0x610   : > { %v2598_v2 = vpop.f32.mrb[36].mxu1 }
 0x611   : > { %v2591_v4 = vpop.f32.mrb[16].mxu0  ;;  %v2041_v5 = vpop.f32.mrb[37].mxu1 }
 0x612   : > { %2064 = vrot.lane.b32.xlu1 %v2584_v33, %s2898_s21  ;;  %v1952_v6 = vpop.f32.mrb[17].mxu0 }
 0x613   : > { %2062 = vrot.lane.b32.xlu0 %v1863_v38, %s2898_s21 }
 0x616   : > { %2068 = vrot.lane.b32.xlu1 %v2591_v4, %s2898_s21 }
 0x617   : > { %2066 = vrot.lane.b32.xlu0 %v1952_v6, %s2898_s21 }
 0x61a   : > { %2072 = vrot.lane.b32.xlu1 %v2598_v2, %s2898_s21 }
 0x61b   : > { %2070 = vrot.lane.b32.xlu0 %v2041_v5, %s2898_s21 }
 0x680   : > { %v2061_v42 = vpop.permute.xlu1 %2060 }
 0x681   : > { %2084 = vst.msk [vmem:[#allocation2 + $0x8] sm:$0xff] %vm2082_vm4, %v2061_v42  ;;  %v2059_v8 = vpop.permute.xlu0 %2058 }
 0x682   : > { %2083 = vst.msk [vmem:[#allocation2] sm:$0xff] %vm2082_vm4, %v2059_v8 }
 0x684   : > { %v2065_v59 = vpop.permute.xlu1 %2064 }
 0x685   : > { %2086 = vst.msk [vmem:[#allocation2 + $0x18] sm:$0xff] %vm2082_vm4, %v2065_v59  ;;  %v2063_v60 = vpop.permute.xlu0 %2062 }
 0x686   : > { %2085 = vst.msk [vmem:[#allocation2 + $0x10] sm:$0xff] %vm2082_vm4, %v2063_v60 }
 0x688   : > { %v2069_v61 = vpop.permute.xlu1 %2068  ;;  %v2092_v31 = vld [vmem:[#allocation2 + $0x8] sm:$0xff] }
 0x689   : > { %2088 = vst.msk [vmem:[#allocation2 + $0x28] sm:$0xff] %vm2082_vm4, %v2069_v61  ;;  %v2067_v9 = vpop.permute.xlu0 %2066  ;;  %v2091_v10 = vld [vmem:[#allocation2] sm:$0xff] }
 0x68a   : > { %2087 = vst.msk [vmem:[#allocation2 + $0x20] sm:$0xff] %vm2082_vm4, %v2067_v9  ;;  %2631 = vmatprep.mubr.f32.mxu0 %v2091_v10 }
 0x68b   : > { %2632 = vmatmul.mubr.f32.vlgmr.msra.gmra.mrb[18].mxu0 %v2092_v31 }
 0x68c   : > { %v2073_v1 = vpop.permute.xlu1 %2072  ;;  %v2094_v39 = vld [vmem:[#allocation2 + $0x18] sm:$0xff] }
 0x68d   : > { %2090 = vst.msk [vmem:[#allocation2 + $0x38] sm:$0xff] %vm2082_vm4, %v2073_v1  ;;  %v2071_v58 = vpop.permute.xlu0 %2070  ;;  %v2093_v36 = vld [vmem:[#allocation2 + $0x10] sm:$0xff] }
 0x68e   : > { %2089 = vst.msk [vmem:[#allocation2 + $0x30] sm:$0xff] %vm2082_vm4, %v2071_v58  ;;  %2634 = vmatprep.mubr.f32.mxu0 %v2093_v36 }
 0x68f   : > { %2635 = vmatmul.mubr.f32.gmra.mrb[20].mxu0 %v2094_v39 }
 0x690   : > { %v2096_v30 = vld [vmem:[#allocation2 + $0x28] sm:$0xff] }
 0x691   : > { %v2095_v40 = vld [vmem:[#allocation2 + $0x20] sm:$0xff] }
 0x692   : > { %2637 = vmatprep.mubr.f32.mxu0 %v2095_v40 }
 0x693   : > { %2638 = vmatmul.mubr.f32.gmra.mrb[22].mxu0 %v2096_v30 }
 0x694   : > { %v2098_v37 = vld [vmem:[#allocation2 + $0x38] sm:$0xff] }
 0x695   : > { %v2097_v34 = vld [vmem:[#allocation2 + $0x30] sm:$0xff] }
 0x696   : > { %2640 = vmatprep.mubr.f32.mxu0 %v2097_v34 }
 0x697   : > { %2641 = vmatmul.mubr.f32.gmra.mrb[24].mxu0 %v2098_v37 }
 0x75e   : > { %v2633_v44 = vpop.f32.mrb[18].mxu0 }
 0x75f   : > { %v2194_v43 = vadd.f32 %v2633_v44, %v2364_v41  ;;  %v2188_v45 = vpop.f32.mrb[19].mxu0 }
 0x760   : > { %v2189_v29 = vadd.f32 %v2364_v41, %v2188_v45 }
 0x761   : > { %2228 = vst.msk [vmem:[%s199_s10 + $0x8] sm:$0xff] %vm221_vm0, %v2194_v43 }
 0x762   : > { %2227 = vst.msk [vmem:[%s199_s10] sm:$0xff] %vm221_vm0, %v2189_v29  ;;  %v2636_v47 = vpop.f32.mrb[20].mxu0 }
 0x763   : > { %v2204_v48 = vadd.f32 %v2636_v47, %v2364_v41  ;;  %v2198_v50 = vpop.f32.mrb[21].mxu0 }
 0x764   : > { %v2199_v52 = vadd.f32 %v2364_v41, %v2198_v50 }
 0x765   : > { %2230 = vst.msk [vmem:[%s199_s10 + $0x18] sm:$0xff] %vm221_vm0, %v2204_v48 }
 0x766   : > { %2229 = vst.msk [vmem:[%s199_s10 + $0x10] sm:$0xff] %vm221_vm0, %v2199_v52  ;;  %v2639_v56 = vpop.f32.mrb[22].mxu0 }
 0x767   : > { %v2214_v62 = vadd.f32 %v2639_v56, %v2364_v41  ;;  %v2208_v7 = vpop.f32.mrb[23].mxu0 }
 0x768   : > { %v2209_v3 = vadd.f32 %v2364_v41, %v2208_v7 }
 0x769   : > { %2232 = vst.msk [vmem:[%s199_s10 + $0x28] sm:$0xff] %vm221_vm0, %v2214_v62 }
 0x76a   : > { %2231 = vst.msk [vmem:[%s199_s10 + $0x20] sm:$0xff] %vm221_vm0, %v2209_v3  ;;  %v2642_v12 = vpop.f32.mrb[24].mxu0 }
 0x76b   : > { %v2224_v13 = vadd.f32 %v2642_v12, %v2364_v41  ;;  %v2218_v14 = vpop.f32.mrb[25].mxu0 }
 0x76c   : > { %v2219_v15 = vadd.f32 %v2364_v41, %v2218_v14 }
 0x76d   : > { %2234 = vst.msk [vmem:[%s199_s10 + $0x38] sm:$0xff] %vm221_vm0, %v2224_v13 }
 0x76e   : > { %2233 = vst.msk [vmem:[%s199_s10 + $0x30] sm:$0xff] %vm221_vm0, %v2219_v15 }
 0x76f PF: > { %s14_s15 = sadd.s32 1, %s2895_s15  }
 0x770   : > { %p11_p4 = scmp.ge.s32.totalorder %s14_s15, 4  }
 0x772   :  { %13 = sbr.rel (!%p11_p4) target bundleno = 1 (0x1), region = 66 }

</bundles_post_ra>
